<compile_context>
chip_gen: v7x
topology: tpu7x:2x2x1
jax: 0.10.0
libtpu: 0.0.40
codegen_flags: <defaults>
</compile_context>

<pallas_src>
import functools

import jax
import jax.numpy as jnp
from jax.experimental import pallas as pl
from jax.experimental.pallas import tpu as pltpu

EPS = 1e-3                      # nn.BatchNorm2d(..., eps=0.001)
COMPUTE_DTYPE = jnp.bfloat16    # streamed activations / weights (accumulation is f32)


# ---------------------------------------------------------------------------
# Generation-aware tiling helpers
# ---------------------------------------------------------------------------
def _vmem_budget():
    """(vmem_limit_bytes, vmem_capacity_bytes); conservative v7x-safe fallback."""
    try:
        cap = int(pltpu.get_tpu_info().vmem_capacity_bytes)
        return min(96 * 1024 * 1024, (cap * 3) // 4), cap
    except Exception:
        return 48 * 1024 * 1024, 64 * 1024 * 1024


def _pick_rows(Ho, Wo, target_pixels, min_tiles=1):
    """Output rows per tile: must divide Ho and keep the lane dim (R*Wo) 128-aligned
    (or be the full image, which is always a legal block)."""
    def legal(r):
        return Ho % r == 0 and (r == Ho or (r * Wo) % 128 == 0)

    best = Ho                                               # whole image: always legal
    for r in range(min(Ho, max(1, target_pixels // max(Wo, 1))), 0, -1):
        if legal(r):
            best = r
            break
    # make sure there are >= min_tiles row tiles (keeps both v7x TensorCores busy)
    if Ho // best < min_tiles:
        for r in range(best - 1, 0, -1):
            if legal(r) and Ho // r >= min_tiles:
                best = r
                break
    return best


# ---------------------------------------------------------------------------
# Shared in-kernel compute: conv(3x3,s2,p1, no bias) + maxpool(2x2,s2)
# ---------------------------------------------------------------------------
def _conv_pool(cb, wmain, wshift, cin, Wo):
    """cb: (6*Cin, L) bf16 phase groups [p00, p10, p10u, p01, p11, p11u], L = R*Wo.
    Returns (conv (Cc, L) f32, pool (Cin, L) f32)."""
    L = cb.shape[-1]
    # taps that read output column wo directly: one dense MXU matmul over all 6 groups
    conv = jnp.dot(wmain, cb, preferred_element_type=jnp.float32)
    # taps that read column wo-1: dense matmul over the 3 odd-column groups, then a
    # one-lane XLU roll + in-kernel mask of the wo==0 column (left zero padding)
    sh = jnp.dot(wshift, cb[3 * cin:], preferred_element_type=jnp.float32)
    sh = pltpu.roll(sh, shift=1, axis=1)
    wo_col = jax.lax.broadcasted_iota(jnp.int32, (1, L), 1) % Wo
    conv = conv + jnp.where(wo_col != 0, sh, 0.0)
    # 2x2 max-pool = elementwise max of the four unshifted phases (f32: v5e has no bf16 VPU)
    p00 = cb[0:cin].astype(jnp.float32)
    p10 = cb[cin:2 * cin].astype(jnp.float32)
    p01 = cb[3 * cin:4 * cin].astype(jnp.float32)
    p11 = cb[4 * cin:5 * cin].astype(jnp.float32)
    pool = jnp.maximum(jnp.maximum(p00, p01), jnp.maximum(p10, p11))
    return conv, pool


def _write_tile_stats(stats_ref, conv, pool, cc):
    """Per-tile centered statistics (sum, M2) written lane-dense into a (2, Cout) block."""
    cnt = jnp.float32(conv.shape[-1])
    s_c = jnp.sum(conv, axis=1)
    s_p = jnp.sum(pool, axis=1)
    d_c = conv - (s_c / cnt)[:, None]
    d_p = pool - (s_p / cnt)[:, None]
    q_c = jnp.sum(d_c * d_c, axis=1)
    q_p = jnp.sum(d_p * d_p, axis=1)
    stats_ref[0:1, 0:cc] = s_c.reshape(1, -1)
    stats_ref[0:1, cc:] = s_p.reshape(1, -1)
    stats_ref[1:2, 0:cc] = q_c.reshape(1, -1)
    stats_ref[1:2, cc:] = q_p.reshape(1, -1)


# ---------------------------------------------------------------------------
# Path A (Cout > 3*Cin): pass 1 = stats only, pass 2 = recompute + BN + ReLU
# ---------------------------------------------------------------------------
def _stats_kernel(conv_ref, wmain_ref, wshift_ref, stats_ref, *, cin, cc, Wo):
    conv, pool = _conv_pool(conv_ref[...], wmain_ref[...], wshift_ref[...], cin, Wo)
    _write_tile_stats(stats_ref, conv, pool, cc)


def _fused_out_kernel(conv_ref, wmain_ref, wshift_ref, scale_ref, shift_ref, o_ref,
                      *, cin, cc, Wo):
    conv, pool = _conv_pool(conv_ref[...], wmain_ref[...], wshift_ref[...], cin, Wo)
    sc = scale_ref[...]                                       # (Cout, 1) f32
    sf = shift_ref[...]
    o_ref[0:cc, :] = jnp.maximum(conv * sc[0:cc] + sf[0:cc], 0.0).astype(o_ref.dtype)
    o_ref[cc:, :] = jnp.maximum(pool * sc[cc:] + sf[cc:], 0.0).astype(o_ref.dtype)


# ---------------------------------------------------------------------------
# Path B (Cout <= 3*Cin): pass 1 = conv+pool -> bf16 pre-BN block + stats,
#                         pass 2 = scale/shift + ReLU epilogue
# ---------------------------------------------------------------------------
def _fuse_store_kernel(conv_ref, wmain_ref, wshift_ref, y_ref, stats_ref, *, cin, cc, Wo):
    conv, pool = _conv_pool(conv_ref[...], wmain_ref[...], wshift_ref[...], cin, Wo)
    conv_r = conv.astype(y_ref.dtype)                 # round first so stats match the
    pool_r = pool.astype(y_ref.dtype)                 # data actually normalized in pass 2
    y_ref[0:cc, :] = conv_r
    y_ref[cc:, :] = pool_r
    _write_tile_stats(stats_ref, conv_r.astype(jnp.float32), pool_r.astype(jnp.float32), cc)


def _bn_relu_kernel(y_ref, scale_ref, shift_ref, o_ref):
    y = y_ref[...].astype(jnp.float32)
    o_ref[...] = jnp.maximum(y * scale_ref[...] + shift_ref[...], 0.0).astype(o_ref.dtype)


# ---------------------------------------------------------------------------
# Wrapper
# ---------------------------------------------------------------------------
def downsampler_block_adapter(x_nchw, conv_w, conv_b, bn_gamma, bn_beta, task,
                              out_dtype=jnp.float32):
    """Forward of DownsamplerBlock_adapter (train-mode / batch-statistics BatchNorm).

    x_nchw   : (N, Cin, H, W) float32 NCHW (H, W even)
    conv_w   : (Cc, Cin, 3, 3) OIHW, Cc = noutput - ninput
    conv_b   : (Cc,)   accepted for interface parity; a per-channel constant cancels
                       exactly under batch-statistics BatchNorm, so it never enters kernels
    bn_gamma : (tasks_preset, Cout), bn_beta: (tasks_preset, Cout), Cout = Cc + Cin
    task     : python int (selects the BN from the ModuleList)
    out_dtype: pass jnp.bfloat16 when downstream encoder blocks run in bf16 (halves writes)
    Returns  : (N, Cout, H//2, W//2) NCHW
    """
    del conv_b                                  # exact cancellation under batch-stat BN
    N, Cin, H, W = x_nchw.shape
    assert H % 2 == 0 and W % 2 == 0, "DownsamplerBlock requires even H, W"
    Cc = conv_w.shape[0]
    Cout = Cc + Cin
    Ho, Wo = H // 2, W // 2

    # ---- generation-aware tiling -------------------------------------------------
    vmem_limit, vmem_cap = _vmem_budget()
    bpp = 24 * Cin + 8 * Cout + 32              # rough per-output-pixel VMEM bytes
    target_pixels = min(16384 if vmem_cap >= (100 << 20) else 8192,
                        max(256, vmem_limit // (2 * bpp)))
    min_tiles = 1 if N >= 2 else 2              # keep both v7x TensorCores busy
    R = _pick_rows(Ho, Wo, target_pixels, min_tiles)
    T = Ho // R

    cparams = pltpu.CompilerParams(
        dimension_semantics=("parallel", "parallel"),
        vmem_limit_bytes=int(vmem_limit))

    x = x_nchw.astype(jnp.float32)

    # ---- glue (XLA): space-to-depth phase split, group order [p00,p10,p10u,p01,p11,p11u]
    p00 = x[:, :, 0::2, 0::2]
    p01 = x[:, :, 0::2, 1::2]
    p10 = x[:, :, 1::2, 0::2]
    p11 = x[:, :, 1::2, 1::2]
    p10u = jnp.pad(p10, ((0, 0), (0, 0), (1, 0), (0, 0)))[:, :, :Ho, :]   # row ho-1, zero top
    p11u = jnp.pad(p11, ((0, 0), (0, 0), (1, 0), (0, 0)))[:, :, :Ho, :]
    conv_in = jnp.concatenate([p00, p10, p10u, p01, p11, p11u], axis=1)   # (N, 6Cin, Ho, Wo)
    conv_in = conv_in.reshape(N, 6 * Cin, Ho * Wo).astype(COMPUTE_DTYPE)

    # ---- conv weights regrouped to the phase order ---------------------------------
    w = conv_w.astype(COMPUTE_DTYPE)                                      # (Cc, Cin, 3, 3)
    # taps that read output column wo directly (all 6 groups)
    wmain = jnp.concatenate([w[:, :, 1, 1], w[:, :, 2, 1], w[:, :, 0, 1],
                             w[:, :, 1, 2], w[:, :, 2, 2], w[:, :, 0, 2]], axis=1)
    # taps that read column wo-1: dense over the last 3 groups [p01, p11, p11u]
    wshift = jnp.concatenate([w[:, :, 1, 0], w[:, :, 2, 0], w[:, :, 0, 0]], axis=1)

    grid = (N, T)
    conv_in_spec = pl.BlockSpec((None, 6 * Cin, R * Wo), lambda n, t: (n, 0, t))
    wmain_spec = pl.BlockSpec((Cc, 6 * Cin), lambda n, t: (0, 0))
    wshift_spec = pl.BlockSpec((Cc, 3 * Cin), lambda n, t: (0, 0))
    stats_spec = pl.BlockSpec((None, None, 2, Cout), lambda n, t: (n, t, 0, 0))
    chw_spec = pl.BlockSpec((None, Cout, R * Wo), lambda n, t: (n, 0, t))
    vec_spec = pl.BlockSpec((Cout, 1), lambda n, t: (0, 0))
    stats_shape = jax.ShapeDtypeStruct((N, T, 2, Cout), jnp.float32)

    # Re-reading conv_in in pass 2 (12*Cin B/px) is cheaper than a bf16 pre-BN round
    # trip (4*Cout B/px) exactly when Cout > 3*Cin.
    recompute = Cout > 3 * Cin

    # ---- pass 1 ---------------------------------------------------------------------
    if recompute:
        stats = pl.pallas_call(
            functools.partial(_stats_kernel, cin=Cin, cc=Cc, Wo=Wo),
            grid=grid,
            in_specs=[conv_in_spec, wmain_spec, wshift_spec],
            out_specs=stats_spec,
            out_shape=stats_shape,
            compiler_params=cparams,
        )(conv_in, wmain, wshift)
        y_pre = None
    else:
        y_pre, stats = pl.pallas_call(
            functools.partial(_fuse_store_kernel, cin=Cin, cc=Cc, Wo=Wo),
            grid=grid,
            in_specs=[conv_in_spec, wmain_spec, wshift_spec],
            out_specs=(chw_spec, stats_spec),
            out_shape=(jax.ShapeDtypeStruct((N, Cout, Ho * Wo), COMPUTE_DTYPE),
                       stats_shape),
            compiler_params=cparams,
        )(conv_in, wmain, wshift)

    # ---- tiny glue (XLA): Welford-merge the per-tile centered sums -------------------
    count = float(N * Ho * Wo)
    cnt_tile = float(R * Wo)
    s_tiles = stats[:, :, 0, :].reshape(N * T, Cout)      # per-tile channel sums
    q_tiles = stats[:, :, 1, :].reshape(N * T, Cout)      # per-tile centered sum-of-squares
    mean = jnp.sum(s_tiles, axis=0) / count
    mu_t = s_tiles / cnt_tile
    m2 = jnp.sum(q_tiles, axis=0) + cnt_tile * jnp.sum((mu_t - mean[None, :]) ** 2, axis=0)
    var = m2 / count                                      # biased var (BN train mode)
    inv = jax.lax.rsqrt(var + EPS)
    gamma = bn_gamma[task].astype(jnp.float32)
    beta = bn_beta[task].astype(jnp.float32)
    scale = (gamma * inv).reshape(Cout, 1)
    shift = (beta - mean * gamma * inv).reshape(Cout, 1)

    # ---- pass 2 ----------------------------------------------------------------------
    out_shape2 = jax.ShapeDtypeStruct((N, Cout, Ho * Wo), out_dtype)
    if recompute:
        out_flat = pl.pallas_call(
            functools.partial(_fused_out_kernel, cin=Cin, cc=Cc, Wo=Wo),
            grid=grid,
            in_specs=[conv_in_spec, wmain_spec, wshift_spec, vec_spec, vec_spec],
            out_specs=chw_spec,
            out_shape=out_shape2,
            compiler_params=cparams,
        )(conv_in, wmain, wshift, scale, shift)
    else:
        out_flat = pl.pallas_call(
            _bn_relu_kernel,
            grid=grid,
            in_specs=[chw_spec, vec_spec, vec_spec],
            out_specs=chw_spec,
            out_shape=out_shape2,
            compiler_params=cparams,
        )(y_pre, scale, shift)

    # (N, Cout, Ho*Wo) -> NCHW for free (no transpose, no concat)
    return out_flat.reshape(N, Cout, Ho, Wo)


# ---------------------------------------------------------------------------
# Pure-JAX f32 reference of the PyTorch forward (for the correctness check)
# ---------------------------------------------------------------------------
def _reference(x_nchw, conv_w, conv_b, bn_gamma, bn_beta, task):
    a = jax.lax.conv_general_dilated(
        x_nchw, conv_w, window_strides=(2, 2), padding=((1, 1), (1, 1)),
        dimension_numbers=('NCHW', 'OIHW', 'NCHW'),
        precision=jax.lax.Precision.HIGHEST)
    a = a + conv_b[None, :, None, None]
    b = jax.lax.reduce_window(x_nchw, -jnp.inf, jax.lax.max,
                              (1, 1, 2, 2), (1, 1, 2, 2), 'VALID')
    y = jnp.concatenate([a, b], axis=1)
    g = bn_gamma[task][None, :, None, None]
    bt = bn_beta[task][None, :, None, None]
    mean = jnp.mean(y, axis=(0, 2, 3), keepdims=True)
    var = jnp.mean((y - mean) ** 2, axis=(0, 2, 3), keepdims=True)
    return jnp.maximum((y - mean) * jax.lax.rsqrt(var + EPS) * g + bt, 0.0)


if __name__ == "__main__":
    key = jax.random.PRNGKey(0)
    tasks = 100                                   # DownsamplerBlock_adapter.tasks_preset

    def run_case(case_key, N, Cin, H, W, Cout, task):
        Cc = Cout - Cin
        k1, k2, k3, k4, k5 = jax.random.split(case_key, 5)
        x = jax.random.normal(k1, (N, Cin, H, W), jnp.float32)
        conv_w = 0.1 * jax.random.normal(k2, (Cc, Cin, 3, 3), jnp.float32)
        conv_b = 0.1 * jax.random.normal(k3, (Cc,), jnp.float32)
        bn_gamma = 1.0 + 0.1 * jax.random.normal(k4, (tasks, Cout), jnp.float32)
        bn_beta = 0.1 * jax.random.normal(k5, (tasks, Cout), jnp.float32)

        fwd = jax.jit(downsampler_block_adapter, static_argnames=("task",))
        out = jax.block_until_ready(fwd(x, conv_w, conv_b, bn_gamma, bn_beta, task=task))
        ref = _reference(x, conv_w, conv_b, bn_gamma, bn_beta, task)
        assert out.shape == (N, Cout, H // 2, W // 2), out.shape
        max_err = float(jnp.max(jnp.abs(out - ref)))
        # bf16 activations/weights are streamed (f32 accumulation) -> bf16 tolerance
        assert jnp.allclose(out, ref, atol=2e-2, rtol=2e-2), max_err
        return max_err

    k_a, k_b = jax.random.split(key)
    # Path A (Cout > 3*Cin): stats-only pass 1, conv recomputed fused with BN+ReLU
    run_case(k_a, N=2, Cin=4, H=16, W=16, Cout=16, task=3)
    # Path B (Cout <= 3*Cin): materialized bf16 pre-BN intermediate + epilogue pass
    run_case(k_b, N=2, Cin=8, H=16, W=16, Cout=16, task=7)
    print("KERNEL_OK")
</pallas_src>

<mosaic_0001>
module attributes {stable_mosaic.version = 11 : i64} {
  func.func @_stats_kernel(%arg0: i32, %arg1: i32, %arg2: memref<1x24x64xbf16, #tpu.memory_space<vmem>>, %arg3: memref<12x24xbf16, #tpu.memory_space<vmem>>, %arg4: memref<12x12xbf16, #tpu.memory_space<vmem>>, %arg5: memref<1x1x2x16xf32, #tpu.memory_space<vmem>>) attributes {dimension_semantics = [#tpu.dimension_semantics<parallel>, #tpu.dimension_semantics<parallel>], iteration_bounds = array<i64: 2, 1>, scalar_prefetch = 0 : i64, scratch_operands = 0 : i64, tpu.core_type = #tpu.core_type<tc>, window_params = [{transform_indices = @transform_0, window_bounds = array<i64: 1, 24, 64>}, {pipeline_mode = #tpu.pipeline_mode<synchronous>, transform_indices = @transform_1, window_bounds = array<i64: 12, 24>}, {pipeline_mode = #tpu.pipeline_mode<synchronous>, transform_indices = @transform_2, window_bounds = array<i64: 12, 12>}, {transform_indices = @transform_3, window_bounds = array<i64: 1, 1, 2, 16>}]} {
    %c0 = arith.constant 0 : index
    %c0_0 = arith.constant 0 : index
    %c0_1 = arith.constant 0 : index
    %0 = vector.load %arg2[%c0, %c0_0, %c0_1] : memref<1x24x64xbf16, #tpu.memory_space<vmem>>, vector<1x24x64xbf16>
    %1 = vector.shape_cast %0 : vector<1x24x64xbf16> to vector<24x64xbf16>
    %c0_2 = arith.constant 0 : index
    %c0_3 = arith.constant 0 : index
    %2 = vector.load %arg3[%c0_2, %c0_3] : memref<12x24xbf16, #tpu.memory_space<vmem>>, vector<12x24xbf16>
    %c0_4 = arith.constant 0 : index
    %c0_5 = arith.constant 0 : index
    %3 = vector.load %arg4[%c0_4, %c0_5] : memref<12x12xbf16, #tpu.memory_space<vmem>>, vector<12x12xbf16>
    %cst = arith.constant dense<0.000000e+00> : vector<12x64xf32>
    %4 = tpu.matmul %2, %1, %cst {dimension_numbers = #tpu.dot_dimension_numbers<[1], [0], [0], [1], [0, 0, 1, 1], [], []>} : vector<12x24xbf16>, vector<24x64xbf16>, vector<12x64xf32> -> vector<12x64xf32>
    %5 = vector.extract_strided_slice %1 {offsets = [12, 0], sizes = [12, 64], strides = [1, 1]} : vector<24x64xbf16> to vector<12x64xbf16>
    %cst_6 = arith.constant dense<0.000000e+00> : vector<12x64xf32>
    %6 = tpu.matmul %3, %5, %cst_6 {dimension_numbers = #tpu.dot_dimension_numbers<[1], [0], [0], [1], [0, 0, 1, 1], [], []>} : vector<12x12xbf16>, vector<12x64xbf16>, vector<12x64xf32> -> vector<12x64xf32>
    %c1_i32 = arith.constant 1 : i32
    %7 = tpu.dynamic_rotate %6 by %c1_i32 dim 1 : vector<12x64xf32>, i32 -> vector<12x64xf32>
    %8 = tpu.iota {dimensions = array<i32: 1>} : vector<1x64xi32>
    %c8_i32 = arith.constant 8 : i32
    %c0_i32 = arith.constant 0 : i32
    %9 = arith.cmpi eq, %c8_i32, %c0_i32 : i32
    %c1_i32_7 = arith.constant 1 : i32
    %10 = arith.select %9, %c1_i32_7, %c8_i32 : i32
    %11 = vector.broadcast %10 : i32 to vector<1x64xi32>
    %12 = arith.remsi %8, %11 : vector<1x64xi32>
    %c0_i32_8 = arith.constant 0 : i32
    %13 = vector.broadcast %c0_i32_8 : i32 to vector<1x64xi32>
    %14 = arith.cmpi ne, %12, %13 : vector<1x64xi32>
    %c0_i32_9 = arith.constant 0 : i32
    %15 = vector.broadcast %c0_i32_9 : i32 to vector<1x64xi32>
    %16 = arith.cmpi slt, %12, %15 : vector<1x64xi32>
    %c0_i32_10 = arith.constant 0 : i32
    %17 = arith.cmpi slt, %10, %c0_i32_10 : i32
    %18 = vector.broadcast %17 : i1 to vector<1x64xi1>
    %19 = vector.broadcast %18 : vector<1x64xi1> to vector<1x64xi1>
    %20 = arith.xori %16, %19 : vector<1x64xi1>
    %21 = arith.andi %20, %14 : vector<1x64xi1>
    %22 = vector.broadcast %10 : i32 to vector<1x64xi32>
    %23 = arith.addi %12, %22 : vector<1x64xi32>
    %24 = arith.select %21, %23, %12 : vector<1x64xi1>, vector<1x64xi32>
    %c0_i32_11 = arith.constant 0 : i32
    %25 = vector.broadcast %c0_i32_11 : i32 to vector<1x64xi32>
    %26 = arith.cmpi ne, %24, %25 : vector<1x64xi32>
    %cst_12 = arith.constant 0.000000e+00 : f32
    %27 = vector.shape_cast %26 : vector<1x64xi1> to vector<1x64xi1>
    %28 = vector.broadcast %27 : vector<1x64xi1> to vector<12x64xi1>
    %29 = vector.broadcast %cst_12 : f32 to vector<12x64xf32>
    %30 = arith.select %28, %7, %29 : vector<12x64xi1>, vector<12x64xf32>
    %31 = arith.addf %4, %30 : vector<12x64xf32>
    %32 = vector.extract_strided_slice %1 {offsets = [0, 0], sizes = [4, 64], strides = [1, 1]} : vector<24x64xbf16> to vector<4x64xbf16>
    %33 = arith.extf %32 : vector<4x64xbf16> to vector<4x64xf32>
    %34 = vector.extract_strided_slice %1 {offsets = [4, 0], sizes = [4, 64], strides = [1, 1]} : vector<24x64xbf16> to vector<4x64xbf16>
    %35 = arith.extf %34 : vector<4x64xbf16> to vector<4x64xf32>
    %36 = vector.extract_strided_slice %1 {offsets = [12, 0], sizes = [4, 64], strides = [1, 1]} : vector<24x64xbf16> to vector<4x64xbf16>
    %37 = arith.extf %36 : vector<4x64xbf16> to vector<4x64xf32>
    %38 = vector.extract_strided_slice %1 {offsets = [16, 0], sizes = [4, 64], strides = [1, 1]} : vector<24x64xbf16> to vector<4x64xbf16>
    %39 = arith.extf %38 : vector<4x64xbf16> to vector<4x64xf32>
    %40 = arith.maximumf %33, %37 : vector<4x64xf32>
    %41 = arith.maximumf %35, %39 : vector<4x64xf32>
    %42 = arith.maximumf %40, %41 : vector<4x64xf32>
    %cst_13 = arith.constant dense<0.000000e+00> : vector<12xf32>
    %43 = vector.multi_reduction <add>, %31, %cst_13 [1] : vector<12x64xf32> to vector<12xf32>
    %cst_14 = arith.constant dense<0.000000e+00> : vector<4xf32>
    %44 = vector.multi_reduction <add>, %42, %cst_14 [1] : vector<4x64xf32> to vector<4xf32>
    %cst_15 = arith.constant 6.400000e+01 : f32
    %45 = vector.broadcast %cst_15 : f32 to vector<12xf32>
    %46 = arith.divf %43, %45 : vector<12xf32>
    %47 = vector.shape_cast %46 : vector<12xf32> to vector<12x1xf32>
    %48 = vector.broadcast %47 : vector<12x1xf32> to vector<12x64xf32>
    %49 = arith.subf %31, %48 : vector<12x64xf32>
    %cst_16 = arith.constant 6.400000e+01 : f32
    %50 = vector.broadcast %cst_16 : f32 to vector<4xf32>
    %51 = arith.divf %44, %50 : vector<4xf32>
    %52 = vector.shape_cast %51 : vector<4xf32> to vector<4x1xf32>
    %53 = vector.broadcast %52 : vector<4x1xf32> to vector<4x64xf32>
    %54 = arith.subf %42, %53 : vector<4x64xf32>
    %55 = arith.mulf %49, %49 : vector<12x64xf32>
    %cst_17 = arith.constant dense<0.000000e+00> : vector<12xf32>
    %56 = vector.multi_reduction <add>, %55, %cst_17 [1] : vector<12x64xf32> to vector<12xf32>
    %57 = arith.mulf %54, %54 : vector<4x64xf32>
    %cst_18 = arith.constant dense<0.000000e+00> : vector<4xf32>
    %58 = vector.multi_reduction <add>, %57, %cst_18 [1] : vector<4x64xf32> to vector<4xf32>
    %59 = vector.shape_cast %43 : vector<12xf32> to vector<1x12xf32>
    %c0_19 = arith.constant 0 : index
    %c0_20 = arith.constant 0 : index
    %c0_21 = arith.constant 0 : index
    %c0_22 = arith.constant 0 : index
    %60 = vector.load %arg5[%c0_19, %c0_20, %c0_21, %c0_22] : memref<1x1x2x16xf32, #tpu.memory_space<vmem>>, vector<1x1x1x12xf32>
    %61 = vector.shape_cast %60 : vector<1x1x1x12xf32> to vector<1x12xf32>
    %62 = vector.shape_cast %59 : vector<1x12xf32> to vector<1x1x1x12xf32>
    tpu.vector_store %arg5[%c0_19, %c0_20, %c0_21, %c0_22], %62 {strides = array<i32>} : memref<1x1x2x16xf32, #tpu.memory_space<vmem>>, vector<1x1x1x12xf32>,
    %63 = vector.shape_cast %44 : vector<4xf32> to vector<1x4xf32>
    %c0_23 = arith.constant 0 : index
    %c0_24 = arith.constant 0 : index
    %c0_25 = arith.constant 0 : index
    %c12 = arith.constant 12 : index
    %64 = vector.load %arg5[%c0_23, %c0_24, %c0_25, %c12] : memref<1x1x2x16xf32, #tpu.memory_space<vmem>>, vector<1x1x1x4xf32>
    %65 = vector.shape_cast %64 : vector<1x1x1x4xf32> to vector<1x4xf32>
    %66 = vector.shape_cast %63 : vector<1x4xf32> to vector<1x1x1x4xf32>
    tpu.vector_store %arg5[%c0_23, %c0_24, %c0_25, %c12], %66 {strides = array<i32>} : memref<1x1x2x16xf32, #tpu.memory_space<vmem>>, vector<1x1x1x4xf32>,
    %67 = vector.shape_cast %56 : vector<12xf32> to vector<1x12xf32>
    %c0_26 = arith.constant 0 : index
    %c0_27 = arith.constant 0 : index
    %c1 = arith.constant 1 : index
    %c0_28 = arith.constant 0 : index
    %68 = vector.load %arg5[%c0_26, %c0_27, %c1, %c0_28] : memref<1x1x2x16xf32, #tpu.memory_space<vmem>>, vector<1x1x1x12xf32>
    %69 = vector.shape_cast %68 : vector<1x1x1x12xf32> to vector<1x12xf32>
    %70 = vector.shape_cast %67 : vector<1x12xf32> to vector<1x1x1x12xf32>
    tpu.vector_store %arg5[%c0_26, %c0_27, %c1, %c0_28], %70 {strides = array<i32>} : memref<1x1x2x16xf32, #tpu.memory_space<vmem>>, vector<1x1x1x12xf32>,
    %71 = vector.shape_cast %58 : vector<4xf32> to vector<1x4xf32>
    %c0_29 = arith.constant 0 : index
    %c0_30 = arith.constant 0 : index
    %c1_31 = arith.constant 1 : index
    %c12_32 = arith.constant 12 : index
    %72 = vector.load %arg5[%c0_29, %c0_30, %c1_31, %c12_32] : memref<1x1x2x16xf32, #tpu.memory_space<vmem>>, vector<1x1x1x4xf32>
    %73 = vector.shape_cast %72 : vector<1x1x1x4xf32> to vector<1x4xf32>
    %74 = vector.shape_cast %71 : vector<1x4xf32> to vector<1x1x1x4xf32>
    tpu.vector_store %arg5[%c0_29, %c0_30, %c1_31, %c12_32], %74 {strides = array<i32>} : memref<1x1x2x16xf32, #tpu.memory_space<vmem>>, vector<1x1x1x4xf32>,
    return
  }
  func.func @transform_0(%arg0: i32, %arg1: i32) -> (i32, i32, i32) {
    %c0_i32 = arith.constant 0 : i32
    %c0_i32_0 = arith.constant 0 : i32
    return %arg0, %c0_i32, %arg1 : i32, i32, i32
  }
  func.func @transform_1(%arg0: i32, %arg1: i32) -> (i32, i32) {
    %c0_i32 = arith.constant 0 : i32
    %c0_i32_0 = arith.constant 0 : i32
    %c0_i32_1 = arith.constant 0 : i32
    return %c0_i32, %c0_i32_0 : i32, i32
  }
  func.func @transform_2(%arg0: i32, %arg1: i32) -> (i32, i32) {
    %c0_i32 = arith.constant 0 : i32
    %c0_i32_0 = arith.constant 0 : i32
    %c0_i32_1 = arith.constant 0 : i32
    return %c0_i32, %c0_i32_0 : i32, i32
  }
  func.func @transform_3(%arg0: i32, %arg1: i32) -> (i32, i32, i32, i32) {
    %c0_i32 = arith.constant 0 : i32
    %c0_i32_0 = arith.constant 0 : i32
    %c0_i32_1 = arith.constant 0 : i32
    return %arg0, %arg1, %c0_i32, %c0_i32_0 : i32, i32, i32, i32
  }
}

module attributes {stable_mosaic.version = 11 : i64} {
  func.func @_fused_out_kernel(%arg0: i32, %arg1: i32, %arg2: memref<1x24x64xbf16, #tpu.memory_space<vmem>>, %arg3: memref<12x24xbf16, #tpu.memory_space<vmem>>, %arg4: memref<12x12xbf16, #tpu.memory_space<vmem>>, %arg5: memref<16x1xf32, #tpu.memory_space<vmem>>, %arg6: memref<16x1xf32, #tpu.memory_space<vmem>>, %arg7: memref<1x16x64xf32, #tpu.memory_space<vmem>>) attributes {dimension_semantics = [#tpu.dimension_semantics<parallel>, #tpu.dimension_semantics<parallel>], iteration_bounds = array<i64: 2, 1>, scalar_prefetch = 0 : i64, scratch_operands = 0 : i64, tpu.core_type = #tpu.core_type<tc>, window_params = [{transform_indices = @transform_0, window_bounds = array<i64: 1, 24, 64>}, {pipeline_mode = #tpu.pipeline_mode<synchronous>, transform_indices = @transform_1, window_bounds = array<i64: 12, 24>}, {pipeline_mode = #tpu.pipeline_mode<synchronous>, transform_indices = @transform_2, window_bounds = array<i64: 12, 12>}, {pipeline_mode = #tpu.pipeline_mode<synchronous>, transform_indices = @transform_3, window_bounds = array<i64: 16, 1>}, {pipeline_mode = #tpu.pipeline_mode<synchronous>, transform_indices = @transform_4, window_bounds = array<i64: 16, 1>}, {transform_indices = @transform_5, window_bounds = array<i64: 1, 16, 64>}]} {
    %c0 = arith.constant 0 : index
    %c0_0 = arith.constant 0 : index
    %c0_1 = arith.constant 0 : index
    %0 = vector.load %arg2[%c0, %c0_0, %c0_1] : memref<1x24x64xbf16, #tpu.memory_space<vmem>>, vector<1x24x64xbf16>
    %1 = vector.shape_cast %0 : vector<1x24x64xbf16> to vector<24x64xbf16>
    %c0_2 = arith.constant 0 : index
    %c0_3 = arith.constant 0 : index
    %2 = vector.load %arg3[%c0_2, %c0_3] : memref<12x24xbf16, #tpu.memory_space<vmem>>, vector<12x24xbf16>
    %c0_4 = arith.constant 0 : index
    %c0_5 = arith.constant 0 : index
    %3 = vector.load %arg4[%c0_4, %c0_5] : memref<12x12xbf16, #tpu.memory_space<vmem>>, vector<12x12xbf16>
    %cst = arith.constant dense<0.000000e+00> : vector<12x64xf32>
    %4 = tpu.matmul %2, %1, %cst {dimension_numbers = #tpu.dot_dimension_numbers<[1], [0], [0], [1], [0, 0, 1, 1], [], []>} : vector<12x24xbf16>, vector<24x64xbf16>, vector<12x64xf32> -> vector<12x64xf32>
    %5 = vector.extract_strided_slice %1 {offsets = [12, 0], sizes = [12, 64], strides = [1, 1]} : vector<24x64xbf16> to vector<12x64xbf16>
    %cst_6 = arith.constant dense<0.000000e+00> : vector<12x64xf32>
    %6 = tpu.matmul %3, %5, %cst_6 {dimension_numbers = #tpu.dot_dimension_numbers<[1], [0], [0], [1], [0, 0, 1, 1], [], []>} : vector<12x12xbf16>, vector<12x64xbf16>, vector<12x64xf32> -> vector<12x64xf32>
    %c1_i32 = arith.constant 1 : i32
    %7 = tpu.dynamic_rotate %6 by %c1_i32 dim 1 : vector<12x64xf32>, i32 -> vector<12x64xf32>
    %8 = tpu.iota {dimensions = array<i32: 1>} : vector<1x64xi32>
    %c8_i32 = arith.constant 8 : i32
    %c0_i32 = arith.constant 0 : i32
    %9 = arith.cmpi eq, %c8_i32, %c0_i32 : i32
    %c1_i32_7 = arith.constant 1 : i32
    %10 = arith.select %9, %c1_i32_7, %c8_i32 : i32
    %11 = vector.broadcast %10 : i32 to vector<1x64xi32>
    %12 = arith.remsi %8, %11 : vector<1x64xi32>
    %c0_i32_8 = arith.constant 0 : i32
    %13 = vector.broadcast %c0_i32_8 : i32 to vector<1x64xi32>
    %14 = arith.cmpi ne, %12, %13 : vector<1x64xi32>
    %c0_i32_9 = arith.constant 0 : i32
    %15 = vector.broadcast %c0_i32_9 : i32 to vector<1x64xi32>
    %16 = arith.cmpi slt, %12, %15 : vector<1x64xi32>
    %c0_i32_10 = arith.constant 0 : i32
    %17 = arith.cmpi slt, %10, %c0_i32_10 : i32
    %18 = vector.broadcast %17 : i1 to vector<1x64xi1>
    %19 = vector.broadcast %18 : vector<1x64xi1> to vector<1x64xi1>
    %20 = arith.xori %16, %19 : vector<1x64xi1>
    %21 = arith.andi %20, %14 : vector<1x64xi1>
    %22 = vector.broadcast %10 : i32 to vector<1x64xi32>
    %23 = arith.addi %12, %22 : vector<1x64xi32>
    %24 = arith.select %21, %23, %12 : vector<1x64xi1>, vector<1x64xi32>
    %c0_i32_11 = arith.constant 0 : i32
    %25 = vector.broadcast %c0_i32_11 : i32 to vector<1x64xi32>
    %26 = arith.cmpi ne, %24, %25 : vector<1x64xi32>
    %cst_12 = arith.constant 0.000000e+00 : f32
    %27 = vector.shape_cast %26 : vector<1x64xi1> to vector<1x64xi1>
    %28 = vector.broadcast %27 : vector<1x64xi1> to vector<12x64xi1>
    %29 = vector.broadcast %cst_12 : f32 to vector<12x64xf32>
    %30 = arith.select %28, %7, %29 : vector<12x64xi1>, vector<12x64xf32>
    %31 = arith.addf %4, %30 : vector<12x64xf32>
    %32 = vector.extract_strided_slice %1 {offsets = [0, 0], sizes = [4, 64], strides = [1, 1]} : vector<24x64xbf16> to vector<4x64xbf16>
    %33 = arith.extf %32 : vector<4x64xbf16> to vector<4x64xf32>
    %34 = vector.extract_strided_slice %1 {offsets = [4, 0], sizes = [4, 64], strides = [1, 1]} : vector<24x64xbf16> to vector<4x64xbf16>
    %35 = arith.extf %34 : vector<4x64xbf16> to vector<4x64xf32>
    %36 = vector.extract_strided_slice %1 {offsets = [12, 0], sizes = [4, 64], strides = [1, 1]} : vector<24x64xbf16> to vector<4x64xbf16>
    %37 = arith.extf %36 : vector<4x64xbf16> to vector<4x64xf32>
    %38 = vector.extract_strided_slice %1 {offsets = [16, 0], sizes = [4, 64], strides = [1, 1]} : vector<24x64xbf16> to vector<4x64xbf16>
    %39 = arith.extf %38 : vector<4x64xbf16> to vector<4x64xf32>
    %40 = arith.maximumf %33, %37 : vector<4x64xf32>
    %41 = arith.maximumf %35, %39 : vector<4x64xf32>
    %42 = arith.maximumf %40, %41 : vector<4x64xf32>
    %c0_13 = arith.constant 0 : index
    %c0_14 = arith.constant 0 : index
    %43 = vector.load %arg5[%c0_13, %c0_14] : memref<16x1xf32, #tpu.memory_space<vmem>>, vector<16x1xf32>
    %c0_15 = arith.constant 0 : index
    %c0_16 = arith.constant 0 : index
    %44 = vector.load %arg6[%c0_15, %c0_16] : memref<16x1xf32, #tpu.memory_space<vmem>>, vector<16x1xf32>
    %45 = vector.extract_strided_slice %43 {offsets = [0, 0], sizes = [12, 1], strides = [1, 1]} : vector<16x1xf32> to vector<12x1xf32>
    %46 = vector.broadcast %45 : vector<12x1xf32> to vector<12x64xf32>
    %47 = arith.mulf %31, %46 : vector<12x64xf32>
    %48 = vector.extract_strided_slice %44 {offsets = [0, 0], sizes = [12, 1], strides = [1, 1]} : vector<16x1xf32> to vector<12x1xf32>
    %49 = vector.broadcast %48 : vector<12x1xf32> to vector<12x64xf32>
    %50 = arith.addf %47, %49 : vector<12x64xf32>
    %cst_17 = arith.constant 0.000000e+00 : f32
    %51 = vector.broadcast %cst_17 : f32 to vector<12x64xf32>
    %52 = arith.maximumf %50, %51 : vector<12x64xf32>
    %c0_18 = arith.constant 0 : index
    %c0_19 = arith.constant 0 : index
    %c0_20 = arith.constant 0 : index
    %53 = vector.load %arg7[%c0_18, %c0_19, %c0_20] : memref<1x16x64xf32, #tpu.memory_space<vmem>>, vector<1x12x64xf32>
    %54 = vector.shape_cast %53 : vector<1x12x64xf32> to vector<12x64xf32>
    %55 = vector.shape_cast %52 : vector<12x64xf32> to vector<1x12x64xf32>
    tpu.vector_store %arg7[%c0_18, %c0_19, %c0_20], %55 {strides = array<i32>} : memref<1x16x64xf32, #tpu.memory_space<vmem>>, vector<1x12x64xf32>,
    %56 = vector.extract_strided_slice %43 {offsets = [12, 0], sizes = [4, 1], strides = [1, 1]} : vector<16x1xf32> to vector<4x1xf32>
    %57 = vector.broadcast %56 : vector<4x1xf32> to vector<4x64xf32>
    %58 = arith.mulf %42, %57 : vector<4x64xf32>
    %59 = vector.extract_strided_slice %44 {offsets = [12, 0], sizes = [4, 1], strides = [1, 1]} : vector<16x1xf32> to vector<4x1xf32>
    %60 = vector.broadcast %59 : vector<4x1xf32> to vector<4x64xf32>
    %61 = arith.addf %58, %60 : vector<4x64xf32>
    %cst_21 = arith.constant 0.000000e+00 : f32
    %62 = vector.broadcast %cst_21 : f32 to vector<4x64xf32>
    %63 = arith.maximumf %61, %62 : vector<4x64xf32>
    %c0_22 = arith.constant 0 : index
    %c12 = arith.constant 12 : index
    %c0_23 = arith.constant 0 : index
    %64 = vector.load %arg7[%c0_22, %c12, %c0_23] : memref<1x16x64xf32, #tpu.memory_space<vmem>>, vector<1x4x64xf32>
    %65 = vector.shape_cast %64 : vector<1x4x64xf32> to vector<4x64xf32>
    %66 = vector.shape_cast %63 : vector<4x64xf32> to vector<1x4x64xf32>
    tpu.vector_store %arg7[%c0_22, %c12, %c0_23], %66 {strides = array<i32>} : memref<1x16x64xf32, #tpu.memory_space<vmem>>, vector<1x4x64xf32>,
    return
  }
  func.func @transform_0(%arg0: i32, %arg1: i32) -> (i32, i32, i32) {
    %c0_i32 = arith.constant 0 : i32
    %c0_i32_0 = arith.constant 0 : i32
    return %arg0, %c0_i32, %arg1 : i32, i32, i32
  }
  func.func @transform_1(%arg0: i32, %arg1: i32) -> (i32, i32) {
    %c0_i32 = arith.constant 0 : i32
    %c0_i32_0 = arith.constant 0 : i32
    %c0_i32_1 = arith.constant 0 : i32
    return %c0_i32, %c0_i32_0 : i32, i32
  }
  func.func @transform_2(%arg0: i32, %arg1: i32) -> (i32, i32) {
    %c0_i32 = arith.constant 0 : i32
    %c0_i32_0 = arith.constant 0 : i32
    %c0_i32_1 = arith.constant 0 : i32
    return %c0_i32, %c0_i32_0 : i32, i32
  }
  func.func @transform_3(%arg0: i32, %arg1: i32) -> (i32, i32) {
    %c0_i32 = arith.constant 0 : i32
    %c0_i32_0 = arith.constant 0 : i32
    %c0_i32_1 = arith.constant 0 : i32
    return %c0_i32, %c0_i32_0 : i32, i32
  }
  func.func @transform_4(%arg0: i32, %arg1: i32) -> (i32, i32) {
    %c0_i32 = arith.constant 0 : i32
    %c0_i32_0 = arith.constant 0 : i32
    %c0_i32_1 = arith.constant 0 : i32
    return %c0_i32, %c0_i32_0 : i32, i32
  }
  func.func @transform_5(%arg0: i32, %arg1: i32) -> (i32, i32, i32) {
    %c0_i32 = arith.constant 0 : i32
    %c0_i32_0 = arith.constant 0 : i32
    return %arg0, %c0_i32, %arg1 : i32, i32, i32
  }
}

</mosaic_0001>

<bundles_post_ra>
// kernel: downsampler_block_adapter.3
= control target key start
LH: loop header
LB: loop body
LE: loop exit
PB: predicated region body
PF: predicated region fallthrough
CT: control target
= control target key end

     0   :  { %s696_s18 = smov 0   ;;  %s698_s19 = smov 0   ;;  %s757_s0 = inlined_call_operand.vmem [shape: bf16[2,24,64], index: 0, kind: input, shape index: {}]   ;;  %s758_s1 = inlined_call_operand.vmem [shape: bf16[12,24], index: 1, kind: input, shape index: {}]   ;;  %s759_s2 = inlined_call_operand.vmem [shape: bf16[12,12], index: 2, kind: input, shape index: {}]   ;;  %s760_s3 = inlined_call_operand.vmem [shape: f32[16,1], index: 3, kind: input, shape index: {}]   ;;  %s761_s4 = inlined_call_operand.vmem [shape: f32[16,1], index: 4, kind: input, shape index: {}]   ;;  %s762_s5 = inlined_call_operand.vmem [shape: f32[2,16,64], index: 5, kind: output, shape index: {}]  }
   0x1   :  { %s700_s20 = smov 0  }
   0x2 LB: > { %s27_s21 = sadd.s32 1, %s655_s19  ;;  %p567_p0 = scmp.ge.s32.totalorder %s659_s20, 1  ;;  %s659_s20 = sphi %s700_s20, %s15_s20   ;;  %s655_s19 = sphi %s698_s19, %s764_s19   ;;  %s651_s18 = sphi %s696_s18, %s763_s18  }
   0x3   : > { %p29_p1 = scmp.ge.s32.totalorder %s27_s21, 2  ;;  %p206_p2 = scmp.lt.s32.totalorder %s659_s20, 3 }
   0x5   : > { %s766_s21 = smov (%p29_p1, %s27_s21), 0  ;;  %p207_p3 = pnand %p567_p0, %p206_p2 }
   0x6   : > { %p240_p4 = scmp.lt.s32.totalorder (!%p207_p3), %s651_s18, 1  ;;  %v661_v0 = vmov (!%p207_p3), 0.0   ;;  %vm662_vm0 = vmmov (!%p207_p3), 0   ;;  %vm279_vm1 = vcmask (!%p207_p3), 1045504   ;;  %v633_v6 = vld [vmem:[%s759_s2] sm:$0x3f] (!%p207_p3)   ;;  %v337_v50 = vlaneseq (!%p207_p3) }
   0x7   : > { %210 = sbr.rel (%p207_p3) target bundleno = 600 (0x258), region = 40  ;;  %586 = vmatprep.subr.bf16.mxu0 (!%p207_p3), %v661_v0  ;;  %588 = vmatprep.mubr.msk.bf16.mxu0 (!%p207_p3), %vm662_vm0, %v661_v0  ;;  %vm275_vm2 = vcmask (!%p207_p3), 97280   ;;  %vm378_vm3 = vcmask (!%p207_p3), 1043456   ;;  %v663_v10 = vmov (!%p207_p3), 0   ;;  %v636_v12 = vld [vmem:[%s758_s1] sm:$0x3f] (!%p207_p3)  }
   0x8   : > { %592 = vmatprep.subr.bf16.mxu1 (!%p207_p3), %v661_v0  ;;  %596 = vmatprep.mubr.msk.bf16.mxu1 (!%p207_p3), %vm662_vm0, %v661_v0  ;;  %vm374_vm4 = vcmask (!%p207_p3), 195584   ;;  %s664_s30 = smov (!%p207_p3), 64   ;;  %v439_v17 = vld [vmem:[%s760_s3 + $0x8] sm:$0xff] (!%p207_p3)  ;;  %v440_v18 = vld [vmem:[%s761_s4] sm:$0xff] (!%p207_p3)  ;;  %vm324_vm5 = vcmask (!%p207_p3), 1048064   ;;  %s665_s14 = smov (!%p207_p3), 65  }
   0x9   : > { %631 = vset.pattern.permute.xlu1 (!%p207_p3), %v663_v10  ;;  %630 = vset.pattern.permute.xlu0 (!%p207_p3), %v663_v10  ;;  %v438_v23 = vld [vmem:[%s760_s3] sm:$0xff] (!%p207_p3)  ;;  %v441_v24 = vld [vmem:[%s761_s4 + $0x8] sm:$0xff] (!%p207_p3)  ;;  %vm470_vm6 = vcmask (!%p207_p3), 519168   ;;  %v338_v51 = vand.u32 (!%p207_p3), 127, %v337_v50  ;;  %vm468_vm8 = vcmask (!%p207_p3), 523264  }
   0xb   : > { %v343_v52 = vand.u32 (!%p207_p3), 7, %v338_v51 }
   0xd   : > { %vm351_vm7 = vcmp.ne.s32.totalorder (!%p207_p3), %v343_v52, 0 }
   0xe   : > { %s768_s18 = smov (!%p240_p4, %s651_s18), 1 }
   0xf   : > { %s600_s22 = smul.u32 12, %s768_s18  ;;  %s580_s15 = sshll.u32 %s768_s18, 4 }
  0x11   : > { %s247_s25 = scalar_lea.vmem %s757_s0, %s600_s22  ;;  %s255_s22 = scalar_lea.vmem %s762_s5, %s580_s15 }
  0x12   : > { %v258_v1 = vld [vmem:[%s247_s25 + $0x4] sm:$0xf]  ;;  %v259_v2 = vld [vmem:[%s247_s25 + $0x8] sm:$0xf]  ;;  %v257_v7 = vld [vmem:[%s247_s25] sm:$0xf] }
  0x13   : > { %v572_v3 = vcombine.low %v258_v1, %v259_v2  ;;  %v576_v8 = vcombine.low %v259_v2, %v259_v2  ;;  %v575_v9 = vcombine.low %v257_v7, %v258_v1  ;;  %v425_v31 = vunpack.c.l.bf16 %v259_v2 }
  0x14   : > { %v424_v34 = vunpack.c.l.bf16 %v258_v1  ;;  %v423_v35 = vunpack.c.l.bf16 %v257_v7 }
  0x15   : > { %v274_v4 = vrot.slane %v572_v3, 2  ;;  %593 = vmatpush3.bf16.msra.mxu1 %v575_v9  ;;  %v380_v11 = vsel %vm378_vm3, %v576_v8, 0  ;;  %v431_v36 = vrot.slane %v425_v31, 4 }
  0x16   : > { %594 = vmatprep.subr.bf16.mxu1 %v661_v0  ;;  %v427_v37 = vrot.slane %v424_v34, 4 }
  0x17   : > { %v281_v5 = vsel %vm279_vm1, %v274_v4, 0  ;;  %v433_v38 = vmax.f32 %v423_v35, %v431_v36 }
  0x18   : > { %587 = vmatpush3.bf16.msra.mxu0 %v281_v5  ;;  %v429_v39 = vmax.f32 %v423_v35, %v427_v37 }
  0x19   : > { %595 = vmatpush3.bf16.msra.mxu1 %v380_v11  ;;  %v435_v40 = vrot.slane %v433_v38, 4 }
  0x1b   : > { %589 = vmatmul.mubr.msk.bf16.vlgmr.msra.gmra.mrb[0].mxu0 %vm275_vm2, %v633_v6  ;;  %v437_v42 = vmax.f32 %v429_v39, %v435_v40 }
  0x1c   : > { %597 = vmatmul.mubr.msk.bf16.vlgmr.msra.gmra.mrb[0].mxu1 %vm374_vm4, %v636_v12 }
  0xee   : > { %v317_v13 = vpop.f32.mrb[0].mxu0 }
  0xef   : > { %325 = vrot.lane.b32.xlu0 %v317_v13, %s664_s30  ;;  %v590_v14 = vpop.f32.mrb[1].mxu0  ;;  %v416_v25 = vpop.f32.mrb[0].mxu1 }
  0xf0   : > { %v320_v15 = vpop.f32.mrb[2].mxu0  ;;  %v598_v26 = vpop.f32.mrb[1].mxu1 }
  0xf1   : > { %v591_v16 = vpop.f32.mrb[3].mxu0  ;;  %v419_v27 = vpop.f32.mrb[2].mxu1 }
  0xf2   : > { %v599_v28 = vpop.f32.mrb[3].mxu1 }
  0xf3   : > { %328 = vrot.lane.b32.xlu0 %v320_v15, %s664_s30 }
  0xf7   : > { %449 = vperm.xlu0 %630, %v439_v17  }
  0xfb   : > { %456 = vperm.xlu0 %630, %v440_v18  }
 0x161   : > { %v326_v19 = vpop.permute.xlu0 %325 }
 0x162   : > { %v327_v20 = vsel %vm324_vm5, %v326_v19, %v317_v13 }
 0x163   : > { %331 = vrot.lane.b32.xlu1 %v327_v20, %s664_s30 }
 0x165   : > { %v329_v21 = vpop.permute.xlu0 %328 }
 0x166   : > { %v330_v22 = vsel %vm324_vm5, %v329_v21, %v320_v15 }
 0x167   : > { %333 = vrot.lane.b32.xlu1 %v330_v22, %s664_s30 }
 0x16b   : > { %444 = vperm.xlu1 %631, %v438_v23  }
 0x16f   : > { %461 = vperm.xlu1 %631, %v441_v24  }
 0x176   : > { %v450_v41 = vpop.permute.xlu0 %449 }
 0x177   : > { %v472_v43 = vrot.slane %v450_v41, 4 }
 0x179   : > { %v474_v45 = vmul.f32 %v472_v43, %v437_v42 }
 0x17a   : > { %v457_v53 = vpop.permute.xlu0 %456 }
 0x1d5   : > { %v332_v29 = vpop.permute.xlu1 %331 }
 0x1d6   : > { %v335_v30 = vsel %vm324_vm5, %v332_v29, %v317_v13 }
 0x1d7   : > { %356 = vrot.lane.b32.xlu1 %v335_v30, %s665_s14 }
 0x1d9   : > { %v334_v32 = vpop.permute.xlu1 %333 }
 0x1da   : > { %v336_v33 = vsel %vm324_vm5, %v334_v32, %v320_v15 }
 0x1db   : > { %358 = vrot.lane.b32.xlu0 %v336_v33, %s665_s14 }
 0x1ea   : > { %v445_v44 = vpop.permute.xlu1 %444 }
 0x1ee   : > { %v462_v46 = vpop.permute.xlu1 %461 }
 0x1ef   : > { %v475_v47 = vrot.slane %v462_v46, 4 }
 0x1f1   : > { %v477_v48 = vadd.f32 %v475_v47, %v474_v45 }
 0x1f3   : > { %v478_v49 = vmax.f32 %v477_v48, 0.0 }
 0x1f5   : > { %479 = vst.msk [vmem:[%s255_s22 + $0xc] sm:$0xf] %vm470_vm6, %v478_v49 }
 0x249   : > { %v357_v54 = vpop.permute.xlu1 %356 }
 0x24a   : > { %v362_v55 = vsel %vm351_vm7, %v357_v54, 0.0 }
 0x24b   : > { %v417_v56 = vadd.f32 %v416_v25, %v362_v55 }
 0x24d   : > { %v452_v57 = vmul.f32 %v445_v44, %v417_v56  ;;  %v359_v58 = vpop.permute.xlu0 %358 }
 0x24e   : > { %v363_v59 = vsel %vm351_vm7, %v359_v58, 0.0 }
 0x24f   : > { %v464_v60 = vadd.f32 %v457_v53, %v452_v57  ;;  %v420_v61 = vadd.f32 %v419_v27, %v363_v59 }
 0x251   : > { %v466_v62 = vmax.f32 %v464_v60, 0.0  ;;  %v453_v63 = vmul.f32 %v450_v41, %v420_v61 }
 0x253   : > { %469 = vst.msk [vmem:[%s255_s22] sm:$0xff] %vm468_vm8, %v466_v62  ;;  %v465_v0 = vadd.f32 %v462_v46, %v453_v63 }
 0x255   : > { %v467_v1 = vmax.f32 %v465_v0, 0.0 }
 0x257   : > { %471 = vst.msk [vmem:[%s255_s22 + $0x8] sm:$0xf] %vm470_vm6, %v467_v1 }
 0x258 PF: > { %s15_s20 = sadd.s32 1, %s659_s20   ;;  %s763_s18 = smov %s655_s19 }
 0x259   : > { %p12_p5 = scmp.ge.s32.totalorder %s15_s20, 4   ;;  %s764_s19 = smov %s766_s21 }
 0x25b   :  { %14 = sbr.rel (!%p12_p5) target bundleno = 2 (0x2), region = 70 }

// kernel: downsampler_block_adapter.2
= control target key start
LH: loop header
LB: loop body
LE: loop exit
PB: predicated region body
PF: predicated region fallthrough
CT: control target
= control target key end

     0   :  { %s651_s12 = smov 0   ;;  %s653_s13 = smov 0   ;;  %s710_s0 = inlined_call_operand.vmem [shape: bf16[2,24,64], index: 0, kind: input, shape index: {}]   ;;  %s711_s1 = inlined_call_operand.vmem [shape: bf16[12,24], index: 1, kind: input, shape index: {}]   ;;  %s712_s2 = inlined_call_operand.vmem [shape: bf16[12,12], index: 2, kind: input, shape index: {}]   ;;  %s713_s3 = inlined_call_operand.vmem [shape: f32[2,1,2,16], index: 3, kind: output, shape index: {}]  }
   0x1   :  { %s655_s14 = smov 0  }
   0x2 LB: > { %s25_s15 = sadd.s32 1, %s621_s13  ;;  %p538_p0 = scmp.ge.s32.totalorder %s625_s14, 1  ;;  %s625_s14 = sphi %s655_s14, %s13_s14   ;;  %s621_s13 = sphi %s653_s13, %s715_s13   ;;  %s617_s12 = sphi %s651_s12, %s714_s12  }
   0x3   : > { %p27_p1 = scmp.ge.s32.totalorder %s25_s15, 2  ;;  %p156_p2 = scmp.lt.s32.totalorder %s625_s14, 3 }
   0x5   : > { %s717_s15 = smov (%p27_p1, %s25_s15), 0  ;;  %p157_p3 = pnand %p538_p0, %p156_p2 }
   0x6   : > { %p185_p4 = scmp.lt.s32.totalorder (!%p157_p3), %s617_s12, 1  ;;  %v627_v0 = vmov (!%p157_p3), 0.0   ;;  %vm628_vm0 = vmmov (!%p157_p3), 0   ;;  %vm223_vm1 = vcmask (!%p157_p3), 1045504   ;;  %v599_v6 = vld [vmem:[%s712_s2] sm:$0x3f] (!%p157_p3)   ;;  %v281_v28 = vlaneseq (!%p157_p3) }
   0x7   : > { %160 = sbr.rel (%p157_p3) target bundleno = 890 (0x37a), region = 32  ;;  %555 = vmatprep.subr.bf16.mxu0 (!%p157_p3), %v627_v0  ;;  %557 = vmatprep.mubr.msk.bf16.mxu0 (!%p157_p3), %vm628_vm0, %v627_v0  ;;  %vm219_vm2 = vcmask (!%p157_p3), 97280   ;;  %vm322_vm3 = vcmask (!%p157_p3), 1043456   ;;  %v602_v11 = vld [vmem:[%s711_s1] sm:$0x3f] (!%p157_p3)   ;;  %vm318_vm4 = vcmask (!%p157_p3), 195584  }
   0x8   : > { %561 = vmatprep.subr.bf16.mxu1 (!%p157_p3), %v627_v0  ;;  %565 = vmatprep.mubr.msk.bf16.mxu1 (!%p157_p3), %vm628_vm0, %v627_v0  ;;  %s629_s24 = smov (!%p157_p3), 64   ;;  %vm268_vm5 = vcmask (!%p157_p3), 1048064   ;;  %s630_s25 = smov (!%p157_p3), 65   ;;  %v282_v31 = vand.u32 (!%p157_p3), 127, %v281_v28  ;;  %vm382_vm7 = vcmask (!%p157_p3), 523264   ;;  %vm386_vm8 = vcmask (!%p157_p3), 519168  }
   0x9   : > { %v415_v49 = vshrl.u32 (!%p157_p3), %v281_v28, 7  ;;  %vm423_vm9 = vcmask (!%p157_p3), 130112   ;;  %vm426_vm10 = vcmask (!%p157_p3), 90112   ;;  %vm435_vm11 = vcmask (!%p157_p3), 122976  }
   0xa   : > { %v287_v34 = vand.u32 (!%p157_p3), 7, %v282_v31  ;;  %v418_v50 = vadd.s32 (!%p157_p3), 4294967288, %v282_v31  ;;  %v429_v51 = vadd.s32 (!%p157_p3), 4294967284, %v282_v31 }
   0xb   : > { %v416_v52 = vsub.s32 (!%p157_p3), %v282_v31, %v415_v49 }
   0xc   : > { %vm295_vm6 = vcmp.ne.s32.totalorder (!%p157_p3), %v287_v34, 0  ;;  %v421_v55 = vsub.s32 (!%p157_p3), %v418_v50, %v415_v49  ;;  %v432_v56 = vsub.s32 (!%p157_p3), %v429_v51, %v415_v49 }
   0xe   : > { %s719_s12 = smov (!%p185_p4, %s617_s12), 1 }
   0xf   : > { %s569_s16 = smul.u32 12, %s719_s12  ;;  %s540_s26 = sshll.u32 %s719_s12, 1 }
  0x10   : > { %s199_s29 = scalar_lea.vmem %s713_s3, %s540_s26 }
  0x11   : > { %s192_s19 = scalar_lea.vmem %s710_s0, %s569_s16 }
  0x12   : > { %v202_v1 = vld [vmem:[%s192_s19 + $0x4] sm:$0xf]  ;;  %v203_v2 = vld [vmem:[%s192_s19 + $0x8] sm:$0xf]  ;;  %v201_v7 = vld [vmem:[%s192_s19] sm:$0xf] }
  0x13   : > { %v542_v3 = vcombine.low %v202_v1, %v203_v2  ;;  %v546_v8 = vcombine.low %v203_v2, %v203_v2  ;;  %v545_v9 = vcombine.low %v201_v7, %v202_v1  ;;  %v369_v29 = vunpack.c.l.bf16 %v203_v2 }
  0x14   : > { %v367_v30 = vunpack.c.l.bf16 %v201_v7  ;;  %v368_v32 = vunpack.c.l.bf16 %v202_v1 }
  0x15   : > { %v218_v4 = vrot.slane %v542_v3, 2  ;;  %562 = vmatpush3.bf16.msra.mxu1 %v545_v9  ;;  %v324_v10 = vsel %vm322_vm3, %v546_v8, 0  ;;  %v375_v33 = vrot.slane %v369_v29, 4 }
  0x16   : > { %563 = vmatprep.subr.bf16.mxu1 %v627_v0  ;;  %v371_v35 = vrot.slane %v368_v32, 4 }
  0x17   : > { %v225_v5 = vsel %vm223_vm1, %v218_v4, 0  ;;  %v377_v36 = vmax.f32 %v367_v30, %v375_v33 }
  0x18   : > { %556 = vmatpush3.bf16.msra.mxu0 %v225_v5  ;;  %v373_v37 = vmax.f32 %v367_v30, %v371_v35 }
  0x19   : > { %564 = vmatpush3.bf16.msra.mxu1 %v324_v10  ;;  %v379_v38 = vrot.slane %v377_v36, 4 }
  0x1b   : > { %558 = vmatmul.mubr.msk.bf16.vlgmr.msra.gmra.mrb[0].mxu0 %vm219_vm2, %v599_v6  ;;  %v381_v42 = vmax.f32 %v373_v37, %v379_v38 }
  0x1c   : > { %566 = vmatmul.mubr.msk.bf16.vlgmr.msra.gmra.mrb[0].mxu1 %vm318_vm4, %v602_v11 }
  0x1d   : > { %v390_v47 = vsel %vm386_vm8, %v381_v42, 0.0 }
  0xee   : > { %v261_v12 = vpop.f32.mrb[0].mxu0 }
  0xef   : > { %269 = vrot.lane.b32.xlu0 %v261_v12, %s629_s24  ;;  %v559_v13 = vpop.f32.mrb[1].mxu0  ;;  %v360_v20 = vpop.f32.mrb[0].mxu1 }
  0xf0   : > { %v264_v14 = vpop.f32.mrb[2].mxu0  ;;  %v567_v21 = vpop.f32.mrb[1].mxu1 }
  0xf1   : > { %v560_v15 = vpop.f32.mrb[3].mxu0  ;;  %v363_v22 = vpop.f32.mrb[2].mxu1 }
  0xf2   : > { %v568_v23 = vpop.f32.mrb[3].mxu1 }
  0xf3   : > { %272 = vrot.lane.b32.xlu0 %v264_v14, %s629_s24 }
 0x161   : > { %v270_v16 = vpop.permute.xlu0 %269 }
 0x162   : > { %v271_v17 = vsel %vm268_vm5, %v270_v16, %v261_v12 }
 0x163   : > { %275 = vrot.lane.b32.xlu1 %v271_v17, %s629_s24 }
 0x165   : > { %v273_v18 = vpop.permute.xlu0 %272 }
 0x166   : > { %v274_v19 = vsel %vm268_vm5, %v273_v18, %v264_v14 }
 0x167   : > { %277 = vrot.lane.b32.xlu1 %v274_v19, %s629_s24 }
 0x1d5   : > { %v276_v24 = vpop.permute.xlu1 %275 }
 0x1d6   : > { %v279_v25 = vsel %vm268_vm5, %v276_v24, %v261_v12 }
 0x1d7   : > { %300 = vrot.lane.b32.xlu0 %v279_v25, %s630_s25 }
 0x1d9   : > { %v278_v26 = vpop.permute.xlu1 %277 }
 0x1da   : > { %v280_v27 = vsel %vm268_vm5, %v278_v26, %v264_v14 }
 0x1db   : > { %302 = vrot.lane.b32.xlu1 %v280_v27, %s630_s25 }
 0x249   : > { %v301_v39 = vpop.permute.xlu0 %300 }
 0x24a   : > { %v306_v40 = vsel %vm295_vm6, %v301_v39, 0.0 }
 0x24b   : > { %v361_v41 = vadd.f32 %v360_v20, %v306_v40 }
 0x24d   : > { %v303_v43 = vpop.permute.xlu1 %302  ;;  %v383_v44 = vsel %vm382_vm7, %v361_v41, 0.0 }
 0x24e   : > { %v307_v45 = vsel %vm295_vm6, %v303_v43, 0.0  ;;  %384 = vadd.xlane.f32.xlu0 %v383_v44 }
 0x24f   : > { %v364_v46 = vadd.f32 %v363_v22, %v307_v45 }
 0x251   : > { %v387_v48 = vsel %vm386_vm8, %v364_v46, 0.0 }
 0x252   : > { %388 = vadd.xlane.f32.xlu1 %v387_v48  ;;  %391 = vadd.xlane.f32.xlu0 %v390_v47 }
 0x2db   : > { %v385_v53 = vpop.xlane.xlu0 %384 }
 0x2dc   : > { %v394_v54 = vmul.f32 0.015625, %v385_v53  ;;  %v417_v58 = vrot.slane %v385_v53, %v416_v52 }
 0x2de   : > { %v396_v57 = vsub.f32 %v361_v41, %v394_v54 }
 0x2df   : > { %v389_v59 = vpop.xlane.xlu1 %388  ;;  %v392_v60 = vpop.xlane.xlu0 %391 }
 0x2e0   : > { %v395_v61 = vmul.f32 0.015625, %v389_v59  ;;  %v422_v62 = vrot.slane %v389_v59, %v421_v55  ;;  %v398_v63 = vmul.f32 0.015625, %v392_v60  ;;  %v433_v0 = vrot.slane %v392_v60, %v432_v56 }
 0x2e1   : > { %v400_v1 = vmul.f32 %v396_v57, %v396_v57 }
 0x2e2   : > { %v424_v2 = vsel %vm423_vm9, %v422_v62, %v417_v58  ;;  %v397_v3 = vsub.f32 %v364_v46, %v395_v61  ;;  %v399_v4 = vsub.f32 %v381_v42, %v398_v63 }
 0x2e3   : > { %427 = vst.msk [vmem:[%s199_s29] sm:$0x1] %vm426_vm10, %v424_v2  ;;  %v402_v5 = vsel %vm382_vm7, %v400_v1, 0.0 }
 0x2e4   : > { %436 = vst.msk [vmem:[%s199_s29] sm:$0x1] %vm435_vm11, %v433_v0  ;;  %403 = vadd.xlane.f32.xlu0 %v402_v5  ;;  %v401_v6 = vmul.f32 %v397_v3, %v397_v3  ;;  %v408_v7 = vmul.f32 %v399_v4, %v399_v4 }
 0x2e6   : > { %v405_v8 = vsel %vm386_vm8, %v401_v6, 0.0  ;;  %v409_v9 = vsel %vm386_vm8, %v408_v7, 0.0 }
 0x2e7   : > { %406 = vadd.xlane.f32.xlu1 %v405_v8 }
 0x2e8   : > { %410 = vadd.xlane.f32.xlu0 %v409_v9 }
 0x371   : > { %v404_v10 = vpop.xlane.xlu0 %403 }
 0x372   : > { %v442_v12 = vrot.slane %v404_v10, %v416_v52 }
 0x374   : > { %v407_v11 = vpop.xlane.xlu1 %406 }
 0x375   : > { %v446_v13 = vrot.slane %v407_v11, %v421_v55  ;;  %v411_v14 = vpop.xlane.xlu0 %410 }
 0x376   : > { %v454_v15 = vrot.slane %v411_v14, %v432_v56 }
 0x377   : > { %v447_v16 = vsel %vm423_vm9, %v446_v13, %v442_v12 }
 0x378   : > { %449 = vst.msk [vmem:[%s199_s29 + $0x1] sm:$0x1] %vm426_vm10, %v447_v16 }
 0x379   : > { %456 = vst.msk [vmem:[%s199_s29 + $0x1] sm:$0x1] %vm435_vm11, %v454_v15 }
 0x37a PF: > { %s13_s14 = sadd.s32 1, %s625_s14   ;;  %s714_s12 = smov %s621_s13 }
 0x37b   : > { %p10_p5 = scmp.ge.s32.totalorder %s13_s14, 4   ;;  %s715_s13 = smov %s717_s15 }
 0x37d   :  { %12 = sbr.rel (!%p10_p5) target bundleno = 2 (0x2), region = 62 }

</bundles_post_ra>
